<compile_context>
chip_gen: v7x
topology: tpu7x:2x2x1
jax: 0.10.0
libtpu: 0.0.40
codegen_flags: <defaults>
</compile_context>

<pallas_src>
import jax
import jax.numpy as jnp
import numpy as np
from jax.experimental import pallas as pl
from jax.experimental.pallas import tpu as pltpu

# ---- problem sizes (small, TPU-tile friendly) -------------------------------
B = 256          # batch (tiled TB=128 -> grid of 2 steps)
TB = 128         # batch tile (full MXU row block on v5e; 2 grid steps for v7x)
D_IN = 128       # input feature dim seen by each sub-model
FEATURES = 128   # sub-model output dim (== gate.out_features)
N_MODELS = 3     # len(model_list)
OUTSHAPE = 3     # regressor output dim
OUT_PAD = 128    # lane-dense padded output width (sliced back to OUTSHAPE)
DROP_P = 0.1     # config['drop_p_ensemble'] (eval mode -> identity)

NF = N_MODELS * FEATURES  # 384


def ensemble_kernel(x_ref, wm_ref, bm_ref, wf_ref, bf_ref, out_ref):
    """Fused ensemble forward for one batch tile.

    x_ref : (TB, D_IN)      bf16   input tile
    wm_ref: (D_IN, NF)      bf16   fused sub-model weights (concat layout)
    bm_ref: (1, NF)         f32    fused sub-model biases
    wf_ref: (NF, OUT_PAD)   bf16   folded gate@regressor weight (zero-padded)
    bf_ref: (1, OUT_PAD)    f32    folded bias (zero-padded)
    out_ref: (TB, OUT_PAD)  f32
    """
    # Sub-models (stand-in bodies) fused into one wide matmul + bias + relu.
    # TODO(synk): real sub-model bodies live in model_list; a single Linear+ReLU
    #             stands in for "everything before the Identity head".
    h = jnp.dot(x_ref[...], wm_ref[...],
                preferred_element_type=jnp.float32) + bm_ref[...]
    h = jnp.maximum(h, 0.0)                       # relu (F.relu(tmp); relu∘relu==relu)
    # Dropout: eval-mode identity.  gate+regressor folded into one linear.
    y = jnp.dot(h.astype(jnp.bfloat16), wf_ref[...],
                preferred_element_type=jnp.float32) + bf_ref[...]
    out_ref[...] = y.astype(out_ref.dtype)


def ensemble_forward(x, wm, bm, wg, bg, wr, br):
    """x: (B, D_IN); wm: (N, D_IN, F); bm: (N, 1, F); wg: (N*F, F); bg: (1, F);
    wr: (F, OUTSHAPE); br: (1, OUTSHAPE).  Returns (B, OUTSHAPE) f32."""
    # --- wrapper-side weight prep (f32 folds, then bf16 casts) --------------
    # Fused sub-model weight: WM[:, i*F:(i+1)*F] = wm[i]  (matches concat order).
    WM = jnp.transpose(wm, (1, 0, 2)).reshape(D_IN, NF)
    BM = bm.reshape(N_MODELS, FEATURES).reshape(1, NF)
    # Fold gate -> regressor (dropout identity):  (N*F, OUTSHAPE)
    WF = wg @ wr
    BF = bg @ wr + br
    # Lane-dense output padding to 128 columns.
    WF = jnp.pad(WF, ((0, 0), (0, OUT_PAD - OUTSHAPE)))
    BF = jnp.pad(BF, ((0, 0), (0, OUT_PAD - OUTSHAPE)))
    # bf16 matmul operands (f32 accumulation inside the kernel).
    x_bf = x.astype(jnp.bfloat16)
    WM_bf = WM.astype(jnp.bfloat16)
    WF_bf = WF.astype(jnp.bfloat16)
    BM = BM.astype(jnp.float32)
    BF = BF.astype(jnp.float32)

    out_padded = pl.pallas_call(
        ensemble_kernel,
        out_shape=jax.ShapeDtypeStruct((B, OUT_PAD), jnp.float32),
        grid=(B // TB,),
        in_specs=[
            pl.BlockSpec((TB, D_IN), lambda b: (b, 0)),
            pl.BlockSpec((D_IN, NF), lambda b: (0, 0)),
            pl.BlockSpec((1, NF), lambda b: (0, 0)),
            pl.BlockSpec((NF, OUT_PAD), lambda b: (0, 0)),
            pl.BlockSpec((1, OUT_PAD), lambda b: (0, 0)),
        ],
        out_specs=pl.BlockSpec((TB, OUT_PAD), lambda b: (b, 0)),
        compiler_params=pltpu.CompilerParams(
            dimension_semantics=("parallel",)),
    )(x_bf, WM_bf, BM, WF_bf, BF)
    return out_padded[:, :OUTSHAPE]


def reference_forward(x, wm, bm, wg, bg, wr, br):
    """Pure-JAX f32 reference matching the PyTorch forward."""
    feats = []
    for i in range(N_MODELS):
        h = jnp.maximum(x @ wm[i] + bm[i], 0.0)   # sub-model (head = Identity)
        feats.append(h)
    tmp = jnp.concatenate(feats, axis=1)          # torch.cat(..., dim=1)
    g = jnp.maximum(tmp, 0.0) @ wg + bg           # gate(F.relu(tmp))
    # dropout: identity in eval
    return g @ wr + br                            # regressor


if __name__ == "__main__":
    key = jax.random.PRNGKey(0)
    kx, kwm, kbm, kwg, kbg, kwr, kbr = jax.random.split(key, 7)

    x = jax.random.normal(kx, (B, D_IN), dtype=jnp.float32)

    # Deterministic synthetic parameters (Linear-like small-scale init).
    wm = jax.random.normal(kwm, (N_MODELS, D_IN, FEATURES), jnp.float32) * 0.05
    bm = jax.random.normal(kbm, (N_MODELS, 1, FEATURES), jnp.float32) * 0.05
    wg = jax.random.normal(kwg, (NF, FEATURES), jnp.float32) * 0.05
    bg = jax.random.normal(kbg, (1, FEATURES), jnp.float32) * 0.05
    wr = jax.random.normal(kwr, (FEATURES, OUTSHAPE), jnp.float32) * 0.05
    br = jax.random.normal(kbr, (1, OUTSHAPE), jnp.float32) * 0.05

    out = ensemble_forward(x, wm, bm, wg, bg, wr, br)
    out = jax.block_until_ready(out)

    ref = reference_forward(x, wm, bm, wg, bg, wr, br)
    # bf16 matmul operands + folded gate@regressor -> relaxed tolerance vs f32 ref.
    np.testing.assert_allclose(np.asarray(out), np.asarray(ref),
                               rtol=2e-2, atol=2e-2)
    assert out.shape == (B, OUTSHAPE)
    print("KERNEL_OK")
</pallas_src>

<mosaic_0001>
module attributes {stable_mosaic.version = 11 : i64} {
  func.func @ensemble_kernel(%arg0: i32, %arg1: memref<128x128xbf16, #tpu.memory_space<vmem>>, %arg2: memref<128x384xbf16, #tpu.memory_space<vmem>>, %arg3: memref<1x384xf32, #tpu.memory_space<vmem>>, %arg4: memref<384x128xbf16, #tpu.memory_space<vmem>>, %arg5: memref<1x128xf32, #tpu.memory_space<vmem>>, %arg6: memref<128x128xf32, #tpu.memory_space<vmem>>) attributes {dimension_semantics = [#tpu.dimension_semantics<parallel>], iteration_bounds = array<i64: 2>, scalar_prefetch = 0 : i64, scratch_operands = 0 : i64, tpu.core_type = #tpu.core_type<tc>, window_params = [{transform_indices = @transform_0, window_bounds = array<i64: 128, 128>}, {pipeline_mode = #tpu.pipeline_mode<synchronous>, transform_indices = @transform_1, window_bounds = array<i64: 128, 384>}, {pipeline_mode = #tpu.pipeline_mode<synchronous>, transform_indices = @transform_2, window_bounds = array<i64: 1, 384>}, {pipeline_mode = #tpu.pipeline_mode<synchronous>, transform_indices = @transform_3, window_bounds = array<i64: 384, 128>}, {pipeline_mode = #tpu.pipeline_mode<synchronous>, transform_indices = @transform_4, window_bounds = array<i64: 1, 128>}, {transform_indices = @transform_5, window_bounds = array<i64: 128, 128>}]} {
    %c0 = arith.constant 0 : index
    %c0_0 = arith.constant 0 : index
    %0 = vector.load %arg1[%c0, %c0_0] : memref<128x128xbf16, #tpu.memory_space<vmem>>, vector<128x128xbf16>
    %c0_1 = arith.constant 0 : index
    %c0_2 = arith.constant 0 : index
    %1 = vector.load %arg2[%c0_1, %c0_2] : memref<128x384xbf16, #tpu.memory_space<vmem>>, vector<128x384xbf16>
    %cst = arith.constant dense<0.000000e+00> : vector<128x384xf32>
    %2 = tpu.matmul %0, %1, %cst {dimension_numbers = #tpu.dot_dimension_numbers<[1], [0], [0], [1], [0, 0, 1, 1], [], []>} : vector<128x128xbf16>, vector<128x384xbf16>, vector<128x384xf32> -> vector<128x384xf32>
    %c0_3 = arith.constant 0 : index
    %c0_4 = arith.constant 0 : index
    %3 = vector.load %arg3[%c0_3, %c0_4] : memref<1x384xf32, #tpu.memory_space<vmem>>, vector<1x384xf32>
    %4 = vector.broadcast %3 : vector<1x384xf32> to vector<128x384xf32>
    %5 = arith.addf %2, %4 : vector<128x384xf32>
    %cst_5 = arith.constant 0.000000e+00 : f32
    %6 = vector.broadcast %cst_5 : f32 to vector<128x384xf32>
    %7 = arith.maximumf %5, %6 : vector<128x384xf32>
    %8 = arith.truncf %7 : vector<128x384xf32> to vector<128x384xbf16>
    %c0_6 = arith.constant 0 : index
    %c0_7 = arith.constant 0 : index
    %9 = vector.load %arg4[%c0_6, %c0_7] : memref<384x128xbf16, #tpu.memory_space<vmem>>, vector<384x128xbf16>
    %cst_8 = arith.constant dense<0.000000e+00> : vector<128x128xf32>
    %10 = tpu.matmul %8, %9, %cst_8 {dimension_numbers = #tpu.dot_dimension_numbers<[1], [0], [0], [1], [0, 0, 1, 1], [], []>} : vector<128x384xbf16>, vector<384x128xbf16>, vector<128x128xf32> -> vector<128x128xf32>
    %c0_9 = arith.constant 0 : index
    %c0_10 = arith.constant 0 : index
    %11 = vector.load %arg5[%c0_9, %c0_10] : memref<1x128xf32, #tpu.memory_space<vmem>>, vector<1x128xf32>
    %12 = vector.broadcast %11 : vector<1x128xf32> to vector<128x128xf32>
    %13 = arith.addf %10, %12 : vector<128x128xf32>
    %c0_11 = arith.constant 0 : index
    %c0_12 = arith.constant 0 : index
    %14 = vector.load %arg6[%c0_11, %c0_12] : memref<128x128xf32, #tpu.memory_space<vmem>>, vector<128x128xf32>
    tpu.vector_store %arg6[%c0_11, %c0_12], %13 {strides = array<i32>} : memref<128x128xf32, #tpu.memory_space<vmem>>, vector<128x128xf32>,
    return
  }
  func.func @transform_0(%arg0: i32) -> (i32, i32) {
    %c0_i32 = arith.constant 0 : i32
    %c0_i32_0 = arith.constant 0 : i32
    return %arg0, %c0_i32 : i32, i32
  }
  func.func @transform_1(%arg0: i32) -> (i32, i32) {
    %c0_i32 = arith.constant 0 : i32
    %c0_i32_0 = arith.constant 0 : i32
    %c0_i32_1 = arith.constant 0 : i32
    return %c0_i32, %c0_i32_0 : i32, i32
  }
  func.func @transform_2(%arg0: i32) -> (i32, i32) {
    %c0_i32 = arith.constant 0 : i32
    %c0_i32_0 = arith.constant 0 : i32
    %c0_i32_1 = arith.constant 0 : i32
    return %c0_i32, %c0_i32_0 : i32, i32
  }
  func.func @transform_3(%arg0: i32) -> (i32, i32) {
    %c0_i32 = arith.constant 0 : i32
    %c0_i32_0 = arith.constant 0 : i32
    %c0_i32_1 = arith.constant 0 : i32
    return %c0_i32, %c0_i32_0 : i32, i32
  }
  func.func @transform_4(%arg0: i32) -> (i32, i32) {
    %c0_i32 = arith.constant 0 : i32
    %c0_i32_0 = arith.constant 0 : i32
    %c0_i32_1 = arith.constant 0 : i32
    return %c0_i32, %c0_i32_0 : i32, i32
  }
  func.func @transform_5(%arg0: i32) -> (i32, i32) {
    %c0_i32 = arith.constant 0 : i32
    %c0_i32_0 = arith.constant 0 : i32
    return %arg0, %c0_i32 : i32, i32
  }
}

</mosaic_0001>

<bundles_post_ra>
// kernel: tpu_custom_call.1
= control target key start
LH: loop header
LB: loop body
LE: loop exit
PB: predicated region body
PF: predicated region fallthrough
CT: control target
= control target key end

     0   :  { %10 = vsyncpa [#allocation3], 0  ;;  %s2243_s0 = inlined_call_operand.hbm [shape: bf16[256,128], index: 0, kind: input, shape index: {}]   ;;  %s2244_s1 = inlined_call_operand.hbm [shape: bf16[128,384], index: 1, kind: input, shape index: {}]   ;;  %s2245_s2 = inlined_call_operand.vmem [shape: f32[1,384], index: 2, kind: input, shape index: {}]   ;;  %s2246_s3 = inlined_call_operand.hbm [shape: bf16[384,128], index: 3, kind: input, shape index: {}]   ;;  %s2247_s4 = inlined_call_operand.vmem [shape: f32[1,128], index: 4, kind: input, shape index: {}]   ;;  %s2248_s5 = inlined_call_operand.hbm [shape: f32[256,128], index: 5, kind: output, shape index: {}]  }
   0x1   :  { %12 = vsyncpa [#allocation3 + $0x1], 0 }
   0x2   :  { %13 = vsyncpa [#allocation6], 0 }
   0x3   :  { %14 = vsyncpa [#allocation4], 0 }
   0x4   :  { %16 = vsyncpa [#allocation4 + $0x1], 0  ;;  %s1887_s18 = smov 0   ;;  %s1889_s19 = smov 0  }
   0x5   :  { %s1891_s20 = smov 0   ;;  %s1893_s21 = smov 0  }
   0x6 LB: > { %s1908_s22 = sadd.s32 4294967295, %s1844_s21   ;;  %s1313_s23 = sadd.s32 4294967294, %s1844_s21   ;;  %s1844_s21 = sphi %s1893_s21, %s2268_s21   ;;  %s1840_s20 = sphi %s1891_s20, %s2267_s20   ;;  %s1836_s19 = sphi %s1889_s19, %s2266_s19   ;;  %s1832_s18 = sphi %s1887_s18, %s2265_s18  }
   0x7   : > { %p42_p0 = scmp.ne.s32.totalorder %s1836_s19, %s1832_s18  ;;  %p2249_p1 = scmp.eq.s32.totalorder %s1908_s22, 0 }
   0x8   : > { %p156_p3 = scmp.eq.s32.totalorder %s1313_s23, 1  ;;  %p1314_p5 = scmp.ge.s32.totalorder %s1844_s21, 1 }
   0x9   : > { %p1917_p4 = por %p2249_p1, %p42_p0  ;;  %p163_p7 = scmp.lt.s32.totalorder %s1844_s21, 3 }
   0xa   : > { %p1922_p6 = por %p156_p3, %p42_p0  ;;  %s1846_s27 = smov [#allocation5]  }
   0xb   : > { %s2252_s24 = scalar_select %p1917_p4, 1, 0 }
   0xc   : > { %s2253_s25 = scalar_select %p1922_p6, 1, 0 }
   0xd   : > { %p1927_p8 = pnand %p1314_p5, %p163_p7  ;;  %s175_s28 = sshll.u32 %s1846_s27, 4  ;;  %s1931_s28 = int_to_ptr.vmem [resolvable:$true] %s175_s28 }
   0xe   : > { %s1847_s30 = smov [#allocation7]   ;;  %s1688_s9 = scalar_lea.hbm %s2244_s1, 3072 }
   0xf   : > { %p1562_p9 = pneg %p1927_p8  ;;  %s191_s6 = sshll.u32 %s1847_s30, 4  ;;  %s1942_s6 = int_to_ptr.vmem [resolvable:$true] %s191_s6 }
  0x10   : > { %p1689_p12 = scmp.ne.s32.totalorder %s2244_s1, %s1688_s9  ;;  %p1695_p5 = scmp.lt.u32.totalorder %s1688_s9, %s2244_s1 }
  0x11   : > { %p1938_p11 = pnand %p1562_p9, %p2249_p1 }
  0x13   : > { %p1690_p13 = pneg %p1938_p11 }
  0x15   : > { %p1691_p0 = pnand %p1690_p13, %p1689_p12 }
  0x17   : > { %p1692_p3 = pneg %p1691_p0 }
  0x19   : > { %p1697_p7 = pnand %p1695_p5, %p1692_p3 }
  0x1b   : > { %1700 = shalt.err (!%p1697_p7)
}
  0x1c   : > { %s1701_s14 = scalar_lea.vmem %s1931_s28, 3072  ;;  %p1709_p2 = scmp.lt.s32.totalorder %s1931_s28, %s1931_s28 }
  0x1d   : > { %p1702_p9 = scmp.ne.s32.totalorder %s1931_s28, %s1701_s14  ;;  %p1710_p12 = scmp.lt.s32.totalorder %s1701_s14, %s1701_s14 }
  0x1f   : > { %p1704_p10 = pnand %p1702_p9, %p1690_p13  ;;  %p1711_p0 = por %p1710_p12, %p1709_p2 }
  0x21   : > { %p1705_p1 = pneg %p1704_p10 }
  0x23   : > { %p1712_p6 = pnand %p1711_p0, %p1705_p1 }
  0x25   : > { %1715 = shalt.err (!%p1712_p6)
}
  0x26   : > { %s1848_s15 = smov 192   ;;  %s1849_s16 = smov 12  }
  0x27   : > { %1565 = dma.hbm_to_vmem [thread:$0]  (!%p1938_p11), %s2244_s1, 3072, %s1931_s28, [#allocation6], %s1848_s15, %s1848_s15, %s1849_s16  }
  0x28   : > { %s1716_s7 = scalar_lea.hbm %s2246_s3, 3072 }
  0x29   : > { %p1717_p2 = scmp.ne.s32.totalorder %s2246_s3, %s1716_s7  ;;  %p1723_p10 = scmp.lt.u32.totalorder %s1716_s7, %s2246_s3 }
  0x2b   : > { %p1719_p1 = pnand %p1717_p2, %p1690_p13 }
  0x2d   : > { %p1720_p6 = pneg %p1719_p1 }
  0x2f   : > { %p1725_p3 = pnand %p1723_p10, %p1720_p6 }
  0x31   : > { %1728 = shalt.err (!%p1725_p3)
}
  0x32   : > { %s1729_s28 = scalar_lea.vmem %s1942_s6, 3072  ;;  %p1737_p12 = scmp.lt.s32.totalorder %s1942_s6, %s1942_s6 }
  0x33   : > { %p1730_p5 = scmp.ne.s32.totalorder %s1942_s6, %s1729_s28  ;;  %p1738_p0 = scmp.lt.s32.totalorder %s1729_s28, %s1729_s28 }
  0x35   : > { %p1732_p7 = pnand %p1730_p5, %p1690_p13  ;;  %p1739_p2 = por %p1738_p0, %p1737_p12 }
  0x37   : > { %p1733_p9 = pneg %p1732_p7 }
  0x39   : > { %p1740_p1 = pnand %p1739_p2, %p1733_p9 }
  0x3b   : > { %1743 = shalt.err (!%p1740_p1)
}
  0x3c   : > { %s1850_s12 = smov 64   ;;  %s1851_s13 = smov 4  }
  0x3d   : > { %1568 = dma.hbm_to_vmem [thread:$0]  (!%p1938_p11), %s2246_s3, 3072, %s1942_s6, [#allocation6], %s1850_s12, %s1850_s12, %s1851_s13  }
  0x3e   : > { %s2000_s16 = sadd.s32 1, %s1844_s21   ;;  %s29_s23 = sadd.s32 1, %s1840_s20 }
  0x3f   : > { %s26_s17 = ssub.s32 %s1844_s21, %s2000_s16  ;;  %p36_p6 = scmp.ne.s32.totalorder %s1840_s20, %s1836_s19 }
  0x40   : > { %p27_p13 = scmp.eq.s32.totalorder %s26_s17, 0  ;;  %p37_p10 = scmp.eq.s32.totalorder %s1844_s21, 0 }
  0x41   : > { %p2256_p5 = scmp.eq.s32.totalorder %s1908_s22, 1  ;;  %p1579_p9 = scmp.lt.s32.totalorder %s1844_s21, 2 }
  0x42   : > { %s2009_s27 = scalar_select %p27_p13, %s1840_s20, %s29_s23  }
  0x43   : > { %p38_p3 = por %p37_p10, %p36_p6  ;;  %p2013_p7 = por %p2256_p5, %p36_p6 }
  0x44   : > { %s208_s30 = sand.u32 1, %s1840_s20   ;;  %s1388_s6 = sshll.u32 %s1844_s21, 10 }
  0x45   : > { %s2257_s29 = scalar_select %p2013_p7, 1, 0 }
  0x46   : > { %s1318_s7 = sshll.u32 %s208_s30, 6  ;;  %s2023_s10 = scalar_lea.hbm %s2243_s0, %s1388_s6 }
  0x47   : > { %s212_s11 = scalar_lea.vmem [#allocation2], %s1318_s7  ;;  %p2027_p11 = pnand %p1579_p9, %p38_p3 }
  0x48   : > { %s219_s28 = sshll.u32 %s212_s11, 4  ;;  %s2031_s15 = scalar_lea.sflag [#allocation3], %s208_s30  ;;  %s2025_s28 = int_to_ptr.vmem [resolvable:$true] %s219_s28 }
  0x49   : > { %s1744_s17 = scalar_lea.hbm %s2023_s10, 1024  ;;  %p1746_p0 = pneg %p2027_p11 }
  0x4a   : > { %p1745_p12 = scmp.ne.s32.totalorder %s2023_s10, %s1744_s17  ;;  %s1749_s6 = scalar_lea.hbm %s2243_s0, 2048 }
  0x4b   : > { %p1750_p13 = scmp.lt.u32.totalorder %s2023_s10, %s2243_s0  ;;  %p1751_p6 = scmp.lt.u32.totalorder %s1749_s6, %s1744_s17 }
  0x4c   : > { %p1747_p2 = pnand %p1746_p0, %p1745_p12  ;;  %p1753_p3 = scmp.lt.u32.totalorder %s1744_s17, %s2023_s10 }
  0x4d   : > { %p1752_p10 = por %p1751_p6, %p1750_p13 }
  0x4e   : > { %p1748_p1 = pneg %p1747_p2 }
  0x4f   : > { %p1754_p5 = por %p1753_p3, %p1752_p10 }
  0x51   : > { %p1755_p9 = pnand %p1754_p5, %p1748_p1 }
  0x53   : > { %1758 = shalt.err (!%p1755_p9)
}
  0x54   : > { %s1759_s30 = scalar_lea.vmem %s2025_s28, 1024  ;;  %s1852_s11 = smov [#allocation2]  }
  0x55   : > { %p1760_p12 = scmp.ne.s32.totalorder %s2025_s28, %s1759_s30  ;;  %s1764_s23 = sshll.u32 %s1852_s11, 4  ;;  %s1765_s23 = int_to_ptr.vmem [resolvable:$false] %s1764_s23 }
  0x56   : > { %s1766_s7 = scalar_lea.vmem %s1765_s23, 2048  ;;  %p1767_p4 = scmp.lt.s32.totalorder %s2025_s28, %s1765_s23 }
  0x57   : > { %p1762_p2 = pnand %p1760_p12, %p1746_p0  ;;  %p1768_p13 = scmp.lt.s32.totalorder %s1766_s7, %s1759_s30 }
  0x59   : > { %p1763_p7 = pneg %p1762_p2  ;;  %p1769_p6 = por %p1768_p13, %p1767_p4 }
  0x5b   : > { %p1770_p10 = pnand %p1769_p6, %p1763_p7 }
  0x5d   : > { %1773 = shalt.err (!%p1770_p10)
}
  0x5e   : > { %1572 = dma.hbm_to_vmem [thread:$0]  (!%p2027_p11), %s2023_s10, 1024, %s2025_s28, %s2031_s15, %s1850_s12, %s1850_s12, %s1851_s13  }
  0x5f   : > { %231 = sbr.rel (%p1927_p8) target bundleno = 653 (0x28d), region = 40  ;;  %s2065_s17 = sand.u32 (!%p1927_p8), 1, %s1836_s19  }
  0x60   : > { %s1322_s6 = sshll.u32 (!%p1927_p8), %s2065_s17, 6  ;;  %s234_s8 = scalar_lea.sflag (!%p1927_p8), [#allocation3], %s2065_s17 }
  0x61   : > { %s2069_s9 = scalar_lea.vmem (!%p1927_p8), [#allocation2], %s1322_s6  ;;  %p2259_p4 = scmp.ne.s32.totalorder (!%p1927_p8), %s2252_s24, 0 }
  0x66   : > { %1819 = dma.done.wait (%p2259_p4), %s234_s8, 1024  }
  0x67   : > { %1821 = vsyncadd (%p2259_p4), %s234_s8, 4294966272  ;;  %p2260_p7 = scmp.eq.s32.totalorder %s1908_s22, 0 }
  0x69   : > { %1823 = dma.done.wait (%p2260_p7), [#allocation6], 6144   ;;  %p2261_p8 = pmov %p2260_p7 }
  0x6a   : > { %v1853_v0 = vmov 0   ;;  %v1624_v1 = vld [vmem:[#allocation5 + $0x4] ss:$12 sps:$4 sm:$0xff]   ;;  %v1626_v2 = vld [vmem:[#allocation5] ss:$12 sps:$4 sm:$0xff]   ;;  %v1659_v36 = vld [vmem:[%s2069_s9 + $0x18] sm:$0xff]   ;;  %v325_v57 = vlaneseq }
  0x6b   : > { %1825 = vsyncadd (%p2261_p8), [#allocation6], 4294961152  ;;  %548 = vmatprep.mubr.bf16.mxu0 %v1853_v0  ;;  %516 = vmatprep.subr.bf16.mxu0 %v1624_v1  ;;  %v1627_v3 = vld [vmem:[#allocation5 + $0x1c] ss:$12 sps:$4 sm:$0xff]   ;;  %v1630_v5 = vld [vmem:[#allocation5 + $0x18] ss:$12 sps:$4 sm:$0xff]  }
  0x6c   : > { %517 = vmatpush1.bf16.msra.mxu0 %v1626_v2  ;;  %v1629_v4 = vld [vmem:[#allocation5 + $0x8] ss:$12 sps:$4 sm:$0xff]   ;;  %v1633_v7 = vld [vmem:[#allocation5 + $0x20] ss:$12 sps:$4 sm:$0xff]   ;;  %v1634_v8 = vld [vmem:[#allocation5 + $0x30] ss:$12 sps:$4 sm:$0xff]  }
  0x6d   : > { %518 = vmatprep.subr.bf16.mxu0 %v1627_v3  ;;  %v1631_v6 = vld [vmem:[#allocation5 + $0x34] ss:$12 sps:$4 sm:$0xff]   ;;  %1486 = vmatprep.subr.bf16.mxu1 %v1629_v4  ;;  %v1637_v9 = vld [vmem:[#allocation5 + $0x38] ss:$12 sps:$4 sm:$0xff]   ;;  %v1641_v12 = vld [vmem:[#allocation5 + $0x50] ss:$12 sps:$4 sm:$0xff]  }
  0x6e   : > { %1487 = vmatpush3.bf16.msra.mxu1 %v1629_v4  ;;  %v1635_v10 = vld [vmem:[#allocation5 + $0x4c] ss:$12 sps:$4 sm:$0xff]   ;;  %v1638_v11 = vld [vmem:[#allocation5 + $0x48] ss:$12 sps:$4 sm:$0xff]   ;;  %v1639_v13 = vld [vmem:[#allocation5 + $0x64] ss:$12 sps:$4 sm:$0xff]  }
  0x6f   : > { %1488 = vmatprep.subr.bf16.mxu1 %v1633_v7  ;;  %v1642_v14 = vld [vmem:[#allocation5 + $0x60] ss:$12 sps:$4 sm:$0xff]   ;;  %v1645_v15 = vld [vmem:[#allocation5 + $0x68] ss:$12 sps:$4 sm:$0xff]   ;;  %v1646_v17 = vld [vmem:[#allocation5 + $0x78] ss:$12 sps:$4 sm:$0xff]  }
  0x70   : > { %519 = vmatpush1.bf16.msra.mxu0 %v1630_v5  ;;  %v1643_v16 = vld [vmem:[#allocation5 + $0x7c] ss:$12 sps:$4 sm:$0xff]   ;;  %v1655_v18 = vld [vmem:[%s2069_s9] sm:$0xff]   ;;  %v1651_v23 = vld [vmem:[#allocation5 + $0xac] ss:$12 sps:$4 sm:$0xff]   ;;  %v326_v58 = vshrl.u32 %v325_v57, 7 }
  0x71   : > { %520 = vmatprep.subr.bf16.mxu0 %v1631_v6  ;;  %v1649_v19 = vld [vmem:[#allocation5 + $0x80] ss:$12 sps:$4 sm:$0xff]   ;;  %1502 = vmatprep.mubr.bf16.mxu1 %v1655_v18  ;;  %v1650_v21 = vld [vmem:[#allocation5 + $0x90] ss:$12 sps:$4 sm:$0xff]   ;;  %v1653_v22 = vld [vmem:[#allocation5 + $0x98] ss:$12 sps:$4 sm:$0xff]  }
  0x72   : > { %1489 = vmatpush3.bf16.msra.mxu1 %v1633_v7  ;;  %v1647_v20 = vld [vmem:[#allocation5 + $0x94] ss:$12 sps:$4 sm:$0xff]   ;;  %v1656_v25 = vld [vmem:[#allocation5 + $0xb0] ss:$12 sps:$4 sm:$0xff]   ;;  %v1657_v28 = vld [vmem:[%s2069_s9 + $0x8] sm:$0xff]   ;;  %v327_v59 = vsub.s32 0, %v326_v58 }
  0x73   : > { %1490 = vmatprep.subr.bf16.mxu1 %v1637_v9  ;;  %v1654_v24 = vld [vmem:[#allocation5 + $0xa8] ss:$12 sps:$4 sm:$0xff]   ;;  %v1667_v26 = vld [vmem:[#allocation7 + $0x80] sm:$0xff]   ;;  %v1677_v37 = vld [vmem:[#allocation7 + $0x98] sm:$0xff]   ;;  %v331_v61 = vsub.s32 1, %v326_v58  ;;  %v335_v62 = vsub.s32 2, %v326_v58 }
  0x74   : > { %521 = vmatpush1.bf16.msra.mxu0 %v1634_v8  ;;  %v1664_v27 = vld [vmem:[#allocation7 + $0x40] sm:$0xff]   ;;  %v1671_v30 = vld [vmem:[#allocation7 + $0x88] sm:$0xff]   ;;  %v1658_v32 = vld [vmem:[%s2069_s9 + $0x10] sm:$0xff]   ;;  %s1325_s10 = sshll.u32 %s2065_s17, 7  ;;  %s1389_s14 = sshll.u32 %s1908_s22, 11 }
  0x75   : > { %522 = vmatprep.subr.bf16.mxu0 %v1635_v10  ;;  %v1665_v29 = vld [vmem:[#allocation7] sm:$0xff]   ;;  %v1666_v31 = vld [vmem:[#allocation7 + $0x48] sm:$0xff]   ;;  %v1674_v33 = vld [vmem:[#allocation7 + $0x90] sm:$0xff]   ;;  %s2160_s28 = scalar_lea.vmem [#allocation8], %s1325_s10  ;;  %s2195_s23 = scalar_lea.hbm %s2248_s5, %s1389_s14 }
  0x76   : > { %1491 = vmatpush3.bf16.msra.mxu1 %v1637_v9  ;;  %v1668_v34 = vld [vmem:[#allocation7 + $0x8] sm:$0xff]   ;;  %v1669_v35 = vld [vmem:[#allocation7 + $0x50] sm:$0xff]   ;;  %v1660_v38 = vld [vmem:[%s2069_s9 + $0x20] sm:$0xff]   ;;  %s1221_s15 = sshll.u32 %s2160_s28, 4  ;;  %s1208_s7 = scalar_lea.sflag [#allocation4], %s2065_s17  ;;  %s2197_s15 = int_to_ptr.vmem [resolvable:$true] %s1221_s15 }
  0x77   : > { %1492 = vmatprep.subr.bf16.mxu1 %v1641_v12  ;;  %v1670_v39 = vld [vmem:[#allocation7 + $0x10] sm:$0xff]   ;;  %v1672_v40 = vld [vmem:[#allocation7 + $0x58] sm:$0xff]   ;;  %v1680_v41 = vld [vmem:[#allocation7 + $0xa0] sm:$0xff]   ;;  %s1774_s6 = scalar_lea.vmem %s2197_s15, 2048  ;;  %p2262_p0 = scmp.ne.s32.totalorder %s2257_s29, 0 }
  0x78   : > { %523 = vmatpush1.bf16.msra.mxu0 %v1638_v11  ;;  %v1673_v42 = vld [vmem:[#allocation7 + $0x18] sm:$0xff]   ;;  %v1675_v43 = vld [vmem:[#allocation7 + $0x60] sm:$0xff]   ;;  %v1661_v44 = vld [vmem:[%s2069_s9 + $0x28] sm:$0xff]   ;;  %p1775_p11 = scmp.ne.s32.totalorder %s2197_s15, %s1774_s6  ;;  %s1854_s22 = smov [#allocation8]  }
  0x79   : > { %524 = vmatprep.subr.bf16.mxu0 %v1639_v13  ;;  %v1676_v45 = vld [vmem:[#allocation7 + $0x20] sm:$0xff]   ;;  %v1678_v46 = vld [vmem:[#allocation7 + $0x68] sm:$0xff]   ;;  %v1662_v47 = vld [vmem:[%s2069_s9 + $0x30] sm:$0xff]   ;;  %s1778_s8 = sshll.u32 %s1854_s22, 4  ;;  %s1779_s8 = int_to_ptr.vmem [resolvable:$false] %s1778_s8 }
  0x7a   : > { %1493 = vmatpush3.bf16.msra.mxu1 %v1641_v12  ;;  %v1679_v48 = vld [vmem:[#allocation7 + $0x28] sm:$0xff]   ;;  %v1663_v49 = vld [vmem:[%s2069_s9 + $0x38] sm:$0xff]   ;;  %v1681_v50 = vld [vmem:[#allocation7 + $0x70] sm:$0xff]   ;;  %p1776_p1 = pnand %p1775_p11, %p2262_p0  ;;  %s1780_s9 = scalar_lea.vmem %s1779_s8, 4096 }
  0x7b   : > { %1494 = vmatprep.subr.bf16.mxu1 %v1645_v15  ;;  %v1683_v51 = vld [vmem:[#allocation7 + $0xa8] sm:$0xff]   ;;  %v1682_v52 = vld [vmem:[#allocation7 + $0x30] sm:$0xff]   ;;  %v1684_v53 = vld [vmem:[#allocation7 + $0x78] sm:$0xff]   ;;  %p1781_p5 = scmp.lt.s32.totalorder %s2197_s15, %s1779_s8  ;;  %p1782_p9 = scmp.lt.s32.totalorder %s1780_s9, %s1774_s6 }
  0x7c   : > { %525 = vmatpush1.bf16.msra.mxu0 %v1642_v14  ;;  %v1686_v54 = vld [vmem:[#allocation7 + $0xb0] sm:$0xff]   ;;  %v1685_v55 = vld [vmem:[#allocation7 + $0x38] sm:$0xff]   ;;  %v323_v60 = vld [vmem:[%s2245_s2] sm:$0x7]  ;;  %p1777_p3 = pneg %p1776_p1 }
  0x7d   : > { %526 = vmatprep.subr.bf16.mxu0 %v1643_v16  ;;  %v1687_v56 = vld [vmem:[#allocation7 + $0xb8] sm:$0xff]   ;;  %v2098_v63 = vrot.slane %v323_v60, %v327_v59  ;;  %v2102_v2 = vrot.slane %v323_v60, %v335_v62  ;;  %p1783_p12 = por %p1782_p9, %p1781_p5 }
  0x7e   : > { %1495 = vmatpush3.bf16.msra.mxu1 %v1645_v15 }
  0x7f   : > { %1496 = vmatprep.subr.bf16.mxu1 %v1649_v19  ;;  %p1784_p2 = pnand %p1783_p12, %p1777_p3 }
  0x80   : > { %527 = vmatpush1.bf16.msra.mxu0 %v1646_v17 }
  0x81   : > { %528 = vmatprep.subr.bf16.mxu0 %v1647_v20 }
  0x82   : > { %1497 = vmatpush3.bf16.msra.mxu1 %v1649_v19 }
  0x83   : > { %1498 = vmatprep.subr.bf16.mxu1 %v1653_v22 }
  0x84   : > { %529 = vmatpush1.bf16.msra.mxu0 %v1650_v21 }
  0x85   : > { %530 = vmatprep.subr.bf16.mxu0 %v1651_v23 }
  0x86   : > { %1499 = vmatpush3.bf16.msra.mxu1 %v1653_v22 }
  0x87   : > { %1500 = vmatprep.subr.bf16.mxu1 %v1656_v25 }
  0x88   : > { %531 = vmatpush1.bf16.msra.mxu0 %v1654_v24 }
  0x89   : > { %1518 = vmatprep.subr.bf16.mxu0 %v1667_v26 }
  0x8a   : > { %1501 = vmatpush3.bf16.msra.mxu1 %v1656_v25 }
  0x8b   : > { %549 = vmatmul.mubr.bf16.vlgmr.msra.gmra.mrb[0].mxu0 %v1655_v18  ;;  %1406 = vmatprep.subr.bf16.mxu1 %v1664_v27 }
  0x8c   : > { %558 = vmatprep.mubr.bf16.mxu0 %v1853_v0  ;;  %1519 = vmatpush3.bf16.msra.mxu0 %v1667_v26 }
  0x8d   : > { %1503 = vmatmul.mubr.bf16.vlgmr.msra.gmra.mrb[0].mxu1 %v1657_v28  ;;  %1520 = vmatprep.subr.bf16.mxu0 %v1671_v30 }
  0x8e   : > { %1506 = vmatprep.mubr.bf16.mxu1 %v1658_v32  ;;  %1407 = vmatpush3.bf16.msra.mxu1 %v1665_v29 }
  0x8f   : > { %1408 = vmatprep.subr.bf16.mxu1 %v1666_v31 }
  0x90   : > { %1521 = vmatpush3.bf16.msra.mxu0 %v1671_v30 }
  0x91   : > { %1522 = vmatprep.subr.bf16.mxu0 %v1674_v33 }
  0x92   : > { %1409 = vmatpush3.bf16.msra.mxu1 %v1668_v34 }
  0x93   : > { %559 = vmatmul.mubr.bf16.gmra.mrb[4].mxu0 %v1657_v28  ;;  %1410 = vmatprep.subr.bf16.mxu1 %v1669_v35 }
  0x94   : > { %568 = vmatprep.mubr.bf16.mxu0 %v1853_v0  ;;  %1523 = vmatpush3.bf16.msra.mxu0 %v1674_v33 }
  0x95   : > { %1507 = vmatmul.mubr.bf16.gmra.mrb[4].mxu1 %v1659_v36  ;;  %1524 = vmatprep.subr.bf16.mxu0 %v1677_v37 }
  0x96   : > { %1510 = vmatprep.mubr.bf16.mxu1 %v1660_v38  ;;  %1411 = vmatpush3.bf16.msra.mxu1 %v1670_v39 }
  0x97   : > { %1412 = vmatprep.subr.bf16.mxu1 %v1672_v40 }
  0x98   : > { %1525 = vmatpush3.bf16.msra.mxu0 %v1677_v37 }
  0x99   : > { %1526 = vmatprep.subr.bf16.mxu0 %v1680_v41 }
  0x9a   : > { %1413 = vmatpush3.bf16.msra.mxu1 %v1673_v42 }
  0x9b   : > { %569 = vmatmul.mubr.bf16.gmra.mrb[8].mxu0 %v1658_v32  ;;  %1414 = vmatprep.subr.bf16.mxu1 %v1675_v43 }
  0x9c   : > { %578 = vmatprep.mubr.bf16.mxu0 %v1853_v0  ;;  %1527 = vmatpush3.bf16.msra.mxu0 %v1680_v41 }
  0x9d   : > { %1511 = vmatmul.mubr.bf16.gmra.mrb[8].mxu1 %v1661_v44  ;;  %1528 = vmatprep.subr.bf16.mxu0 %v1683_v51 }
  0x9e   : > { %1514 = vmatprep.mubr.bf16.mxu1 %v1662_v47  ;;  %1415 = vmatpush3.bf16.msra.mxu1 %v1676_v45 }
  0x9f   : > { %1416 = vmatprep.subr.bf16.mxu1 %v1678_v46 }
  0xa0   : > { %1529 = vmatpush3.bf16.msra.mxu0 %v1683_v51 }
  0xa1   : > { %1530 = vmatprep.subr.bf16.mxu0 %v1686_v54 }
  0xa2   : > { %1417 = vmatpush3.bf16.msra.mxu1 %v1679_v48 }
  0xa3   : > { %579 = vmatmul.mubr.bf16.gmra.mrb[12].mxu0 %v1659_v36  ;;  %1418 = vmatprep.subr.bf16.mxu1 %v1681_v50 }
  0xa4   : > { %588 = vmatprep.mubr.bf16.mxu0 %v1853_v0  ;;  %1531 = vmatpush3.bf16.msra.mxu0 %v1686_v54 }
  0xa5   : > { %1515 = vmatmul.mubr.bf16.gmra.mrb[12].mxu1 %v1663_v49  ;;  %1532 = vmatprep.subr.bf16.mxu0 %v1687_v56 }
  0xa6   : > { %1419 = vmatpush3.bf16.msra.mxu1 %v1682_v52 }
  0xa7   : > { %1420 = vmatprep.subr.bf16.mxu1 %v1684_v53 }
  0xa8   : > { %1533 = vmatpush3.bf16.msra.mxu0 %v1687_v56 }
  0xaa   : > { %1421 = vmatpush3.bf16.msra.mxu1 %v1685_v55 }
  0xab   : > { %589 = vmatmul.mubr.bf16.gmra.mrb[16].mxu0 %v1660_v38 }
  0xac   : > { %598 = vmatprep.mubr.bf16.mxu0 %v1853_v0 }
  0xb3   : > { %599 = vmatmul.mubr.bf16.gmra.mrb[20].mxu0 %v1661_v44 }
  0xb4   : > { %608 = vmatprep.mubr.bf16.mxu0 %v1853_v0 }
  0xbb   : > { %609 = vmatmul.mubr.bf16.gmra.mrb[24].mxu0 %v1662_v47 }
  0xbc   : > { %618 = vmatprep.mubr.bf16.mxu0 %v1853_v0  ;;  %v2100_v0 = vrot.slane %v323_v60, %v331_v61 }
  0xc3   : > { %619 = vmatmul.mubr.bf16.gmra.mrb[28].mxu0 %v1663_v49 }
 0x15e   : > { %v550_v1 = vpop.f32.mrb[0].mxu0 }
 0x15f   : > { %v551_v3 = vadd.f32 %v550_v1, %v2098_v63  ;;  %v552_v4 = vpop.f32.mrb[1].mxu0 }
 0x160   : > { %v553_v5 = vadd.f32 %v552_v4, %v2100_v0  ;;  %v554_v6 = vpop.f32.mrb[2].mxu0  ;;  %v1504_v9 = vpop.f32.mrb[0].mxu1 }
 0x161   : > { %v555_v7 = vadd.f32 %v554_v6, %v2098_v63  ;;  %v556_v8 = vpop.f32.mrb[3].mxu0  ;;  %v672_v11 = vadd.f32 %v1504_v9, %v2102_v2  ;;  %v663_v12 = vpop.f32.mrb[1].mxu1  ;;  %v726_v13 = vmax.f32 %v551_v3, 0.0 }
 0x162   : > { %v557_v10 = vadd.f32 %v556_v8, %v2100_v0  ;;  %v664_v15 = vadd.f32 %v663_v12, %v2102_v2  ;;  %v1505_v16 = vpop.f32.mrb[2].mxu1  ;;  %v727_v17 = vmax.f32 %v553_v5, 0.0 }
 0x163   : > { %v729_v14 = vmax.f32 %v555_v7, 0.0  ;;  %v734_v19 = vmax.f32 %v672_v11, 0.0  ;;  %v675_v20 = vadd.f32 %v1505_v16, %v2102_v2  ;;  %v666_v21 = vpop.f32.mrb[3].mxu1 }
 0x164   : > { %v730_v18 = vmax.f32 %v557_v10, 0.0  ;;  %v728_v23 = vmax.f32 %v664_v15, 0.0  ;;  %v667_v24 = vadd.f32 %v666_v21, %v2102_v2 }
 0x165   : > { %v774_v22 = vpack.c.bf16 %v729_v14, %v726_v13  ;;  %v737_v26 = vmax.f32 %v675_v20, 0.0 }
 0x166   : > { %v775_v25 = vpack.c.bf16 %v730_v18, %v727_v17  ;;  %v560_v27 = vpop.f32.mrb[4].mxu0  ;;  %v731_v28 = vmax.f32 %v667_v24, 0.0 }
 0x167   : > { %v561_v29 = vadd.f32 %v560_v27, %v2098_v63  ;;  %v562_v30 = vpop.f32.mrb[5].mxu0  ;;  %v779_v31 = vpack.c.bf16 %v737_v26, %v734_v19 }
 0x168   : > { %v563_v32 = vadd.f32 %v562_v30, %v2100_v0  ;;  %v564_v33 = vpop.f32.mrb[6].mxu0  ;;  %1029 = vmatprep.mubr.bf16.mxu1 %v775_v25  ;;  %v776_v34 = vpack.c.bf16 %v731_v28, %v728_v23  ;;  %v1508_v37 = vpop.f32.mrb[4].mxu1 }
 0x169   : > { %v565_v35 = vadd.f32 %v564_v33, %v2098_v63  ;;  %v566_v36 = vpop.f32.mrb[7].mxu0  ;;  %1030 = vmatmul.mubr.bf16.vlgmr.msra.gmra.mrb[16].mxu1 %v774_v22  ;;  %v688_v39 = vadd.f32 %v1508_v37, %v2102_v2  ;;  %v679_v40 = vpop.f32.mrb[5].mxu1  ;;  %v732_v41 = vmax.f32 %v561_v29, 0.0 }
 0x16a   : > { %v567_v38 = vadd.f32 %v566_v36, %v2100_v0  ;;  %1534 = vmatprep.mubr.bf16.mxu0 %v776_v34  ;;  %v680_v43 = vadd.f32 %v679_v40, %v2102_v2  ;;  %v1509_v44 = vpop.f32.mrb[6].mxu1  ;;  %v733_v45 = vmax.f32 %v563_v32, 0.0 }
 0x16b   : > { %v735_v42 = vmax.f32 %v565_v35, 0.0  ;;  %1535 = vmatmul.mubr.bf16.vlgmr.msra.gmra.mrb[32].mxu0 %v779_v31  ;;  %v746_v47 = vmax.f32 %v688_v39, 0.0  ;;  %v691_v48 = vadd.f32 %v1509_v44, %v2102_v2  ;;  %v682_v49 = vpop.f32.mrb[7].mxu1 }
 0x16c   : > { %v736_v46 = vmax.f32 %v567_v38, 0.0  ;;  %v740_v51 = vmax.f32 %v680_v43, 0.0  ;;  %v683_v52 = vadd.f32 %v682_v49, %v2102_v2 }
 0x16d   : > { %v777_v50 = vpack.c.bf16 %v735_v42, %v732_v41  ;;  %v749_v55 = vmax.f32 %v691_v48, 0.0 }
 0x16e   : > { %v778_v53 = vpack.c.bf16 %v736_v46, %v733_v45  ;;  %v570_v54 = vpop.f32.mrb[8].mxu0  ;;  %v743_v58 = vmax.f32 %v683_v52, 0.0 }
 0x16f   : > { %v571_v56 = vadd.f32 %v570_v54, %v2098_v63  ;;  %v572_v57 = vpop.f32.mrb[9].mxu0  ;;  %v785_v61 = vpack.c.bf16 %v749_v55, %v746_v47 }
 0x170   : > { %v573_v59 = vadd.f32 %v572_v57, %v2100_v0  ;;  %v574_v60 = vpop.f32.mrb[10].mxu0  ;;  %1037 = vmatprep.mubr.bf16.mxu1 %v778_v53  ;;  %v782_v3 = vpack.c.bf16 %v743_v58, %v740_v51  ;;  %v1512_v4 = vpop.f32.mrb[8].mxu1 }
 0x171   : > { %v575_v62 = vadd.f32 %v574_v60, %v2098_v63  ;;  %v576_v1 = vpop.f32.mrb[11].mxu0  ;;  %1038 = vmatmul.mubr.bf16.gmra.mrb[20].mxu1 %v777_v50  ;;  %v704_v6 = vadd.f32 %v1512_v4, %v2102_v2  ;;  %v695_v7 = vpop.f32.mrb[9].mxu1  ;;  %v738_v8 = vmax.f32 %v571_v56, 0.0 }
 0x172   : > { %v577_v5 = vadd.f32 %v576_v1, %v2100_v0  ;;  %1538 = vmatprep.mubr.bf16.mxu0 %v782_v3  ;;  %v696_v10 = vadd.f32 %v695_v7, %v2102_v2  ;;  %v1513_v11 = vpop.f32.mrb[10].mxu1  ;;  %v739_v12 = vmax.f32 %v573_v59, 0.0 }
 0x173   : > { %v741_v9 = vmax.f32 %v575_v62, 0.0  ;;  %1539 = vmatmul.mubr.bf16.gmra.mrb[36].mxu0 %v785_v61  ;;  %v758_v14 = vmax.f32 %v704_v6, 0.0  ;;  %v707_v15 = vadd.f32 %v1513_v11, %v2102_v2  ;;  %v698_v16 = vpop.f32.mrb[11].mxu1 }
 0x174   : > { %v742_v13 = vmax.f32 %v577_v5, 0.0  ;;  %v752_v18 = vmax.f32 %v696_v10, 0.0  ;;  %v699_v19 = vadd.f32 %v698_v16, %v2102_v2 }
 0x175   : > { %v780_v17 = vpack.c.bf16 %v741_v9, %v738_v8  ;;  %v761_v22 = vmax.f32 %v707_v15, 0.0 }
 0x176   : > { %v781_v20 = vpack.c.bf16 %v742_v13, %v739_v12  ;;  %v580_v21 = vpop.f32.mrb[12].mxu0  ;;  %v755_v25 = vmax.f32 %v699_v19, 0.0 }
 0x177   : > { %v581_v23 = vadd.f32 %v580_v21, %v2098_v63  ;;  %v582_v24 = vpop.f32.mrb[13].mxu0  ;;  %v791_v28 = vpack.c.bf16 %v761_v22, %v758_v14 }
 0x178   : > { %v583_v26 = vadd.f32 %v582_v24, %v2100_v0  ;;  %v584_v27 = vpop.f32.mrb[14].mxu0  ;;  %1045 = vmatprep.mubr.bf16.mxu1 %v781_v20  ;;  %v788_v31 = vpack.c.bf16 %v755_v25, %v752_v18  ;;  %v1516_v32 = vpop.f32.mrb[12].mxu1 }
 0x179   : > { %v585_v29 = vadd.f32 %v584_v27, %v2098_v63  ;;  %v586_v30 = vpop.f32.mrb[15].mxu0  ;;  %1046 = vmatmul.mubr.bf16.gmra.mrb[24].mxu1 %v780_v17  ;;  %v720_v34 = vadd.f32 %v1516_v32, %v2102_v2  ;;  %v711_v35 = vpop.f32.mrb[13].mxu1  ;;  %v744_v36 = vmax.f32 %v581_v23, 0.0 }
 0x17a   : > { %v587_v33 = vadd.f32 %v586_v30, %v2100_v0  ;;  %1542 = vmatprep.mubr.bf16.mxu0 %v788_v31  ;;  %v712_v38 = vadd.f32 %v711_v35, %v2102_v2  ;;  %v1517_v39 = vpop.f32.mrb[14].mxu1  ;;  %v745_v40 = vmax.f32 %v583_v26, 0.0 }
 0x17b   : > { %v747_v37 = vmax.f32 %v585_v29, 0.0  ;;  %1543 = vmatmul.mubr.bf16.gmra.mrb[40].mxu0 %v791_v28  ;;  %v770_v42 = vmax.f32 %v720_v34, 0.0  ;;  %v723_v43 = vadd.f32 %v1517_v39, %v2102_v2  ;;  %v714_v44 = vpop.f32.mrb[15].mxu1 }
 0x17c   : > { %v748_v41 = vmax.f32 %v587_v33, 0.0  ;;  %v764_v46 = vmax.f32 %v712_v38, 0.0  ;;  %v715_v47 = vadd.f32 %v714_v44, %v2102_v2 }
 0x17d   : > { %v783_v45 = vpack.c.bf16 %v747_v37, %v744_v36  ;;  %v773_v50 = vmax.f32 %v723_v43, 0.0 }
 0x17e   : > { %v784_v48 = vpack.c.bf16 %v748_v41, %v745_v40  ;;  %v590_v49 = vpop.f32.mrb[16].mxu0  ;;  %v767_v53 = vmax.f32 %v715_v47, 0.0 }
 0x17f   : > { %v591_v51 = vadd.f32 %v590_v49, %v2098_v63  ;;  %v592_v52 = vpop.f32.mrb[17].mxu0  ;;  %v797_v56 = vpack.c.bf16 %v773_v50, %v770_v42  ;;  %v2155_v49 = vld [vmem:[%s2247_s4] ss:$0 sm:$0xff] }
 0x180   : > { %v593_v54 = vadd.f32 %v592_v52, %v2100_v0  ;;  %v594_v55 = vpop.f32.mrb[18].mxu0  ;;  %1053 = vmatprep.mubr.bf16.mxu1 %v784_v48  ;;  %v794_v59 = vpack.c.bf16 %v767_v53, %v764_v46 }
 0x181   : > { %v595_v57 = vadd.f32 %v594_v55, %v2098_v63  ;;  %v596_v58 = vpop.f32.mrb[19].mxu0  ;;  %1054 = vmatmul.mubr.bf16.gmra.mrb[28].mxu1 %v783_v45  ;;  %v750_v2 = vmax.f32 %v591_v51, 0.0 }
 0x182   : > { %v597_v60 = vadd.f32 %v596_v58, %v2100_v0  ;;  %1546 = vmatprep.mubr.bf16.mxu0 %v794_v59  ;;  %v751_v62 = vmax.f32 %v593_v54, 0.0 }
 0x183   : > { %v753_v61 = vmax.f32 %v595_v57, 0.0  ;;  %1547 = vmatmul.mubr.bf16.gmra.mrb[44].mxu0 %v797_v56 }
 0x184   : > { %v754_v1 = vmax.f32 %v597_v60, 0.0 }
 0x185   : > { %v786_v3 = vpack.c.bf16 %v753_v61, %v750_v2 }
 0x186   : > { %v787_v4 = vpack.c.bf16 %v754_v1, %v751_v62  ;;  %v600_v5 = vpop.f32.mrb[20].mxu0 }
 0x187   : > { %v601_v6 = vadd.f32 %v600_v5, %v2098_v63  ;;  %v602_v7 = vpop.f32.mrb[21].mxu0 }
 0x188   : > { %v603_v8 = vadd.f32 %v602_v7, %v2100_v0  ;;  %v604_v9 = vpop.f32.mrb[22].mxu0  ;;  %1061 = vmatprep.mubr.bf16.mxu1 %v787_v4 }
 0x189   : > { %v605_v10 = vadd.f32 %v604_v9, %v2098_v63  ;;  %v606_v11 = vpop.f32.mrb[23].mxu0  ;;  %1062 = vmatmul.mubr.bf16.gmra.mrb[32].mxu1 %v786_v3  ;;  %v756_v13 = vmax.f32 %v601_v6, 0.0 }
 0x18a   : > { %v607_v12 = vadd.f32 %v606_v11, %v2100_v0  ;;  %v757_v15 = vmax.f32 %v603_v8, 0.0 }
 0x18b   : > { %v759_v14 = vmax.f32 %v605_v10, 0.0 }
 0x18c   : > { %v760_v16 = vmax.f32 %v607_v12, 0.0 }
 0x18d   : > { %v789_v17 = vpack.c.bf16 %v759_v14, %v756_v13 }
 0x18e   : > { %v790_v18 = vpack.c.bf16 %v760_v16, %v757_v15  ;;  %v610_v19 = vpop.f32.mrb[24].mxu0 }
 0x18f   : > { %v611_v20 = vadd.f32 %v610_v19, %v2098_v63  ;;  %v612_v21 = vpop.f32.mrb[25].mxu0 }
 0x190   : > { %v613_v22 = vadd.f32 %v612_v21, %v2100_v0  ;;  %v614_v23 = vpop.f32.mrb[26].mxu0  ;;  %1069 = vmatprep.mubr.bf16.mxu1 %v790_v18 }
 0x191   : > { %v615_v24 = vadd.f32 %v614_v23, %v2098_v63  ;;  %v616_v25 = vpop.f32.mrb[27].mxu0  ;;  %1070 = vmatmul.mubr.bf16.gmra.mrb[36].mxu1 %v789_v17  ;;  %v762_v27 = vmax.f32 %v611_v20, 0.0 }
 0x192   : > { %v617_v26 = vadd.f32 %v616_v25, %v2100_v0  ;;  %v763_v29 = vmax.f32 %v613_v22, 0.0 }
 0x193   : > { %v765_v28 = vmax.f32 %v615_v24, 0.0 }
 0x194   : > { %v766_v30 = vmax.f32 %v617_v26, 0.0 }
 0x195   : > { %v792_v31 = vpack.c.bf16 %v765_v28, %v762_v27 }
 0x196   : > { %v793_v32 = vpack.c.bf16 %v766_v30, %v763_v29  ;;  %v620_v33 = vpop.f32.mrb[28].mxu0 }
 0x197   : > { %v621_v34 = vadd.f32 %v620_v33, %v2098_v63  ;;  %v622_v35 = vpop.f32.mrb[29].mxu0 }
 0x198   : > { %v623_v36 = vadd.f32 %v622_v35, %v2100_v0  ;;  %v624_v37 = vpop.f32.mrb[30].mxu0  ;;  %1077 = vmatprep.mubr.bf16.mxu1 %v793_v32 }
 0x199   : > { %v625_v38 = vadd.f32 %v624_v37, %v2098_v63  ;;  %v626_v39 = vpop.f32.mrb[31].mxu0  ;;  %1078 = vmatmul.mubr.bf16.gmra.mrb[40].mxu1 %v792_v31  ;;  %v768_v41 = vmax.f32 %v621_v34, 0.0 }
 0x19a   : > { %v627_v40 = vadd.f32 %v626_v39, %v2100_v0  ;;  %v769_v43 = vmax.f32 %v623_v36, 0.0 }
 0x19b   : > { %v771_v42 = vmax.f32 %v625_v38, 0.0 }
 0x19c   : > { %v772_v44 = vmax.f32 %v627_v40, 0.0 }
 0x19d   : > { %v795_v45 = vpack.c.bf16 %v771_v42, %v768_v41 }
 0x19e   : > { %v796_v46 = vpack.c.bf16 %v772_v44, %v769_v43 }
 0x1a0   : > { %1085 = vmatprep.mubr.bf16.mxu1 %v796_v46 }
 0x1a1   : > { %1086 = vmatmul.mubr.bf16.gmra.mrb[44].mxu1 %v795_v45 }
 0x23c   : > { %v1422_v47 = vpop.f32.mrb[16].mxu1 }
 0x23d   : > { %v1423_v48 = vpop.f32.mrb[17].mxu1 }
 0x23e   : > { %v1424_v63 = vadd.f32 %v1423_v48, %v1422_v47  ;;  %v1425_v50 = vpop.f32.mrb[18].mxu1  ;;  %v1536_v0 = vpop.f32.mrb[32].mxu0 }
 0x23f   : > { %v1426_v51 = vpop.f32.mrb[19].mxu1  ;;  %v1128_v54 = vpop.f32.mrb[33].mxu0 }
 0x240   : > { %v1427_v52 = vadd.f32 %v1426_v51, %v1425_v50  ;;  %v1032_v53 = vadd.f32 %v1424_v63, %v2155_v49  ;;  %v1537_v55 = vpop.f32.mrb[34].mxu0 }
 0x241   : > { %v1131_v58 = vpop.f32.mrb[35].mxu0 }
 0x242   : > { %v1129_v56 = vadd.f32 %v1128_v54, %v1032_v53  ;;  %v1035_v57 = vadd.f32 %v1427_v52, %v2155_v49 }
 0x244   : > { %1191 = vst [vmem:[%s2160_s28] sm:$0xff] %v1129_v56  ;;  %v1132_v59 = vadd.f32 %v1131_v58, %v1035_v57  ;;  %v1428_v60 = vpop.f32.mrb[20].mxu1 }
 0x245   : > { %v1429_v2 = vpop.f32.mrb[21].mxu1 }
 0x246   : > { %1192 = vst [vmem:[%s2160_s28 + $0x8] sm:$0xff] %v1132_v59  ;;  %v1430_v61 = vadd.f32 %v1429_v2, %v1428_v60  ;;  %v1431_v62 = vpop.f32.mrb[22].mxu1  ;;  %v1540_v3 = vpop.f32.mrb[36].mxu0 }
 0x247   : > { %v1432_v1 = vpop.f32.mrb[23].mxu1  ;;  %v1144_v6 = vpop.f32.mrb[37].mxu0 }
 0x248   : > { %v1040_v4 = vadd.f32 %v1430_v61, %v2155_v49  ;;  %v1433_v5 = vadd.f32 %v1432_v1, %v1431_v62  ;;  %v1541_v7 = vpop.f32.mrb[38].mxu0 }
 0x249   : > { %v1147_v10 = vpop.f32.mrb[39].mxu0 }
 0x24a   : > { %v1137_v8 = vadd.f32 %v1536_v0, %v1040_v4  ;;  %v1043_v9 = vadd.f32 %v1433_v5, %v2155_v49 }
 0x24c   : > { %1193 = vst [vmem:[%s2160_s28 + $0x10] sm:$0xff] %v1137_v8  ;;  %v1140_v11 = vadd.f32 %v1537_v55, %v1043_v9  ;;  %v1434_v12 = vpop.f32.mrb[24].mxu1 }
 0x24d   : > { %v1435_v13 = vpop.f32.mrb[25].mxu1 }
 0x24e   : > { %1194 = vst [vmem:[%s2160_s28 + $0x18] sm:$0xff] %v1140_v11  ;;  %v1436_v14 = vadd.f32 %v1435_v13, %v1434_v12  ;;  %v1437_v15 = vpop.f32.mrb[26].mxu1  ;;  %v1544_v17 = vpop.f32.mrb[40].mxu0 }
 0x24f   : > { %v1438_v16 = vpop.f32.mrb[27].mxu1  ;;  %v1160_v20 = vpop.f32.mrb[41].mxu0 }
 0x250   : > { %v1439_v18 = vadd.f32 %v1438_v16, %v1437_v15  ;;  %v1048_v19 = vadd.f32 %v1436_v14, %v2155_v49  ;;  %v1545_v21 = vpop.f32.mrb[42].mxu0 }
 0x251   : > { %v1163_v24 = vpop.f32.mrb[43].mxu0 }
 0x252   : > { %v1145_v22 = vadd.f32 %v1144_v6, %v1048_v19  ;;  %v1051_v23 = vadd.f32 %v1439_v18, %v2155_v49 }
 0x254   : > { %1195 = vst [vmem:[%s2160_s28 + $0x20] sm:$0xff] %v1145_v22  ;;  %v1148_v25 = vadd.f32 %v1147_v10, %v1051_v23  ;;  %v1440_v26 = vpop.f32.mrb[28].mxu1 }
 0x255   : > { %v1441_v27 = vpop.f32.mrb[29].mxu1 }
 0x256   : > { %1196 = vst [vmem:[%s2160_s28 + $0x28] sm:$0xff] %v1148_v25  ;;  %v1442_v28 = vadd.f32 %v1441_v27, %v1440_v26  ;;  %v1443_v29 = vpop.f32.mrb[30].mxu1  ;;  %v1548_v31 = vpop.f32.mrb[44].mxu0 }
 0x257   : > { %v1444_v30 = vpop.f32.mrb[31].mxu1  ;;  %v1176_v34 = vpop.f32.mrb[45].mxu0 }
 0x258   : > { %v1056_v32 = vadd.f32 %v1442_v28, %v2155_v49  ;;  %v1445_v33 = vadd.f32 %v1444_v30, %v1443_v29  ;;  %v1549_v35 = vpop.f32.mrb[46].mxu0 }
 0x259   : > { %v1179_v38 = vpop.f32.mrb[47].mxu0 }
 0x25a   : > { %v1153_v36 = vadd.f32 %v1540_v3, %v1056_v32  ;;  %v1059_v37 = vadd.f32 %v1445_v33, %v2155_v49 }
 0x25c   : > { %1197 = vst [vmem:[%s2160_s28 + $0x30] sm:$0xff] %v1153_v36  ;;  %v1156_v39 = vadd.f32 %v1541_v7, %v1059_v37  ;;  %v1446_v40 = vpop.f32.mrb[32].mxu1 }
 0x25d   : > { %v1447_v41 = vpop.f32.mrb[33].mxu1 }
 0x25e   : > { %1198 = vst [vmem:[%s2160_s28 + $0x38] sm:$0xff] %v1156_v39  ;;  %v1448_v42 = vadd.f32 %v1447_v41, %v1446_v40  ;;  %v1449_v43 = vpop.f32.mrb[34].mxu1 }
 0x25f   : > { %v1450_v44 = vpop.f32.mrb[35].mxu1 }
 0x260   : > { %v1451_v45 = vadd.f32 %v1450_v44, %v1449_v43  ;;  %v1064_v46 = vadd.f32 %v1448_v42, %v2155_v49 }
 0x262   : > { %v1161_v47 = vadd.f32 %v1160_v20, %v1064_v46  ;;  %v1067_v48 = vadd.f32 %v1451_v45, %v2155_v49 }
 0x264   : > { %1199 = vst [vmem:[%s2160_s28 + $0x40] sm:$0xff] %v1161_v47  ;;  %v1164_v63 = vadd.f32 %v1163_v24, %v1067_v48  ;;  %v1452_v50 = vpop.f32.mrb[36].mxu1 }
 0x265   : > { %v1453_v51 = vpop.f32.mrb[37].mxu1 }
 0x266   : > { %1200 = vst [vmem:[%s2160_s28 + $0x48] sm:$0xff] %v1164_v63  ;;  %v1454_v0 = vadd.f32 %v1453_v51, %v1452_v50  ;;  %v1455_v52 = vpop.f32.mrb[38].mxu1 }
 0x267   : > { %v1456_v53 = vpop.f32.mrb[39].mxu1 }
 0x268   : > { %v1072_v54 = vadd.f32 %v1454_v0, %v2155_v49  ;;  %v1457_v55 = vadd.f32 %v1456_v53, %v1455_v52 }
 0x26a   : > { %v1169_v56 = vadd.f32 %v1544_v17, %v1072_v54  ;;  %v1075_v57 = vadd.f32 %v1457_v55, %v2155_v49 }
 0x26c   : > { %1201 = vst [vmem:[%s2160_s28 + $0x50] sm:$0xff] %v1169_v56  ;;  %v1172_v58 = vadd.f32 %v1545_v21, %v1075_v57  ;;  %v1458_v59 = vpop.f32.mrb[40].mxu1 }
 0x26d   : > { %v1459_v60 = vpop.f32.mrb[41].mxu1 }
 0x26e   : > { %1202 = vst [vmem:[%s2160_s28 + $0x58] sm:$0xff] %v1172_v58  ;;  %v1460_v2 = vadd.f32 %v1459_v60, %v1458_v59  ;;  %v1461_v61 = vpop.f32.mrb[42].mxu1 }
 0x26f   : > { %v1462_v62 = vpop.f32.mrb[43].mxu1 }
 0x270   : > { %v1463_v1 = vadd.f32 %v1462_v62, %v1461_v61  ;;  %v1080_v3 = vadd.f32 %v1460_v2, %v2155_v49 }
 0x272   : > { %v1177_v4 = vadd.f32 %v1176_v34, %v1080_v3  ;;  %v1083_v5 = vadd.f32 %v1463_v1, %v2155_v49 }
 0x274   : > { %1203 = vst [vmem:[%s2160_s28 + $0x60] sm:$0xff] %v1177_v4  ;;  %v1180_v6 = vadd.f32 %v1179_v38, %v1083_v5  ;;  %v1464_v7 = vpop.f32.mrb[44].mxu1 }
 0x275   : > { %v1465_v8 = vpop.f32.mrb[45].mxu1 }
 0x276   : > { %1204 = vst [vmem:[%s2160_s28 + $0x68] sm:$0xff] %v1180_v6  ;;  %v1466_v9 = vadd.f32 %v1465_v8, %v1464_v7  ;;  %v1467_v10 = vpop.f32.mrb[46].mxu1 }
 0x277   : > { %v1468_v11 = vpop.f32.mrb[47].mxu1 }
 0x278   : > { %v1088_v12 = vadd.f32 %v1466_v9, %v2155_v49  ;;  %v1469_v13 = vadd.f32 %v1468_v11, %v1467_v10 }
 0x27a   : > { %v1185_v14 = vadd.f32 %v1548_v31, %v1088_v12  ;;  %v1091_v15 = vadd.f32 %v1469_v13, %v2155_v49 }
 0x27c   : > { %1205 = vst [vmem:[%s2160_s28 + $0x70] sm:$0xff] %v1185_v14  ;;  %v1188_v16 = vadd.f32 %v1549_v35, %v1091_v15 }
 0x27e   : > { %1206 = vst [vmem:[%s2160_s28 + $0x78] sm:$0xff] %v1188_v16 }
 0x27f   : > { %1787 = shalt.err (!%p1784_p2)
}
 0x280   : > { %s1788_s24 = scalar_lea.hbm %s2195_s23, 2048  ;;  %s1792_s13 = scalar_lea.hbm %s2248_s5, 4096 }
 0x281   : > { %p1789_p13 = scmp.ne.s32.totalorder %s2195_s23, %s1788_s24  ;;  %p1793_p4 = scmp.lt.u32.totalorder %s2195_s23, %s2248_s5 }
 0x282   : > { %p1794_p7 = scmp.lt.u32.totalorder %s1792_s13, %s1788_s24  ;;  %p1796_p11 = scmp.lt.u32.totalorder %s1788_s24, %s2195_s23 }
 0x283   : > { %p1790_p6 = pnand %p1789_p13, %p2262_p0 }
 0x284   : > { %p1795_p8 = por %p1794_p7, %p1793_p4 }
 0x285   : > { %p1791_p10 = pneg %p1790_p6 }
 0x286   : > { %p1797_p1 = por %p1796_p11, %p1795_p8 }
 0x288   : > { %p1798_p3 = pnand %p1797_p1, %p1791_p10 }
 0x28a   : > { %1801 = shalt.err (!%p1798_p3)
}
 0x28b   : > { %s1855_s14 = smov 128   ;;  %s1856_s30 = smov 8  }
 0x28c   : > { %1560 = dma.vmem_to_hbm [thread:$0]  (%p2262_p0), %s2197_s15, 2048, %s2195_s23, %s1208_s7, %s1855_s14, %s1855_s14, %s1856_s30  }
 0x28d PF: > { %s1236_s11 = sand.u32 1, %s1832_s18   ;;  %p2263_p5 = scmp.ne.s32.totalorder %s2253_s25, 0 }
 0x28e   : > { %p2264_p9 = scmp.ge.s32.totalorder %s1844_s21, 2  ;;  %s1237_s6 = scalar_lea.sflag [#allocation4], %s1236_s11 }
 0x290   : > { %p1574_p12 = pnand %p2264_p9, %p2263_p5 }
 0x292   : > { %1827 = dma.done.wait (!%p1574_p12), %s1237_s6, 2048  }
 0x293   : > { %1829 = vsyncadd (!%p1574_p12), %s1237_s6, 4294965248  ;;  %p19_p2 = scmp.ge.s32.totalorder %s2000_s16, 4   ;;  %s2265_s18 = smov %s1836_s19 }
 0x294   : > { %s2266_s19 = smov %s1840_s20  ;;  %s2267_s20 = smov %s2009_s27 }
 0x295   : > { %s2268_s21 = smov %s2000_s16  ;;  %21 = sbr.rel (!%p19_p2) target bundleno = 6 (0x6), region = 93 }
 0x29c   :  { %1242 = vsyncpa [#allocation3], 1 }
 0x29d   :  { %1244 = vsyncpa [#allocation3 + $0x1], 1 }
 0x29e   :  { %1245 = vsyncpa [#allocation6], 1 }
 0x29f   :  { %1246 = vsyncpa [#allocation4], 1 }
 0x2a0   :  { %1248 = vsyncpa [#allocation4 + $0x1], 1 }

</bundles_post_ra>
